<compile_context>
chip_gen: v7x
topology: tpu7x:2x2x1
jax: 0.10.0
libtpu: 0.0.40
codegen_flags: <defaults>
</compile_context>

<pallas_src>
import functools

import jax
import jax.numpy as jnp
from jax.experimental import pallas as pl
from jax.experimental.pallas import tpu as pltpu


# ----------------------------------------------------------------------------
# Kernels
# ----------------------------------------------------------------------------
def _fused_kernel(x_ref, w_ref, b_ref, o_ref, *, k, cin, Wp, Wo, Ho, L):
    # x_ref : (Cin, Hp*Wp)   padded image, spatially flattened, bf16
    # w_ref : (tco, k*k*Cin) fused weight N'.C', columns ordered (kh, kw, cin)
    # b_ref : (tco, 1)       bias column (f32, zeros when bias=False)
    # o_ref : (tco, Ho*Wo)   lane-dense output tile
    tco = o_ref.shape[0]
    acc = jnp.zeros((tco, L), jnp.float32)
    for kh in range(k):                      # k^2 shift-matmuls (static unroll)
        for kw in range(k):
            s = kh * Wp + kw
            idx = kh * k + kw
            w_piece = w_ref[:, idx * cin:(idx + 1) * cin]       # (tco, Cin)
            x_piece = x_ref[:, s:s + L]                         # (Cin, L)
            acc = acc + jnp.dot(w_piece, x_piece,
                                preferred_element_type=jnp.float32)
    acc = acc + b_ref[...]
    # Compact Wp-strided columns -> dense Ho*Wo columns (static slices only).
    # TODO(synk): switch to a row-tiled grid axis when Ho is large so this
    #             unrolled loop (and the resident image) stays bounded.
    for oh in range(Ho):
        o_ref[:, oh * Wo:(oh + 1) * Wo] = (
            acc[:, oh * Wp:oh * Wp + Wo].astype(o_ref.dtype))


def _twodot_kernel(x_ref, cw_ref, nw_ref, b_ref, o_ref, *, k, cin, Wp, Wo, Ho, L):
    # Pruned-rank path: (r, Cin) shift-matmuls, then a (Cout, r) x (r, L) dot.
    # The second dot runs in f32 for parity with the fp32 torch conv.
    r = cw_ref.shape[0]
    acc1 = jnp.zeros((r, L), jnp.float32)
    for kh in range(k):
        for kw in range(k):
            s = kh * Wp + kw
            idx = kh * k + kw
            c_piece = cw_ref[:, idx * cin:(idx + 1) * cin]      # (r, Cin) bf16
            x_piece = x_ref[:, s:s + L]                         # (Cin, L) bf16
            acc1 = acc1 + jnp.dot(c_piece, x_piece,
                                  preferred_element_type=jnp.float32)
    acc = jnp.dot(nw_ref[...], acc1, preferred_element_type=jnp.float32)
    acc = acc + b_ref[...]
    for oh in range(Ho):
        o_ref[:, oh * Wo:(oh + 1) * Wo] = (
            acc[:, oh * Wp:oh * Wp + Wo].astype(o_ref.dtype))


# ----------------------------------------------------------------------------
# Wrapper
# ----------------------------------------------------------------------------
def _vmem_capacity_bytes():
    try:
        return int(pltpu.get_tpu_info().vmem_capacity_bytes)
    except Exception:
        return 64 << 20          # conservative (v7x per-TC)


def _num_tensorcores():
    try:
        return max(1, int(getattr(jax.devices()[0], "num_cores", 1)))
    except Exception:
        return 1


def svd_conv2d_forward(x, N, C, Sigma, bias=None, *, kernel_size, padding,
                       compute_dtype=jnp.bfloat16):
    """x: (B, Cin, H, W) NCHW float32. Returns (B, Cout, Ho, Wo) in x.dtype."""
    B, Cin, H, W = x.shape
    Cout, r = N.shape
    k = kernel_size
    out_dtype = x.dtype

    Hp, Wp = H + 2 * padding, W + 2 * padding
    Ho, Wo = Hp - k + 1, Wp - k + 1
    Mo = Ho * Wo
    F = Hp * Wp                       # flattened padded image length
    L = (Ho - 1) * Wp + Wo            # working width of the shifted slices
    Kr = k * k * Cin

    # ---- weight construction (glue; matches the torch diag/mm math) --------
    s = jnp.sqrt(jnp.abs(Sigma.astype(jnp.float32)))
    Cw = s[:, None] * C.astype(jnp.float32)          # (r, Cin*k*k) = diag(sqrt(S))@C
    Nw = N.astype(jnp.float32) * s[None, :]          # (Cout, r)    = N@diag(sqrt(S))
    b_col = (jnp.zeros((Cout,), jnp.float32) if bias is None
             else bias.astype(jnp.float32)).reshape(Cout, 1)

    def _reorder(wmat):
        # columns (cin, kh, kw) -> (kh, kw, cin) to match the kernel's slicing
        rows = wmat.shape[0]
        return wmat.reshape(rows, Cin, k, k).transpose(0, 2, 3, 1).reshape(rows, Kr)

    # Fuse the two factors whenever that is no more per-step work (always true
    # at full rank); keep the factored path for pruned-rank weights.
    fuse = (Kr * Cout) <= r * (Kr + Cout)

    # ---- input prep: single fused pad + bf16 cast, flatten spatially -------
    # TODO(synk): fold the zero padding + bf16 cast into the kernel (masked
    #             edges) to drop this one remaining HBM round-trip of the input.
    xflat = jnp.pad(x.astype(compute_dtype),
                    ((0, 0), (0, 0), (padding, padding), (padding, padding))
                    ).reshape(B, Cin, F)

    # ---- generation-aware VMEM budget & grid sizing -------------------------
    in_b = jnp.dtype(compute_dtype).itemsize
    out_b = jnp.dtype(out_dtype).itemsize
    budget = max(16 << 20, int(_vmem_capacity_bytes() * 0.75))
    n_tc = _num_tensorcores()

    def vmem_needed(tco):
        x_bytes = Cin * F * in_b
        o_bytes = tco * Mo * out_b
        if fuse:
            w_bytes = tco * Kr * in_b + tco * 4
        else:
            w_bytes = r * Kr * in_b + tco * r * 4 + tco * 4
        live = Cin * L * in_b + tco * L * 4                 # slice + accumulator
        if not fuse:
            live += r * L * 4
        return 2 * (x_bytes + o_bytes + w_bytes) + live     # x2: double buffering

    def _split_ok(nc):
        return Cout % nc == 0 and (nc == 1 or (Cout // nc) % 8 == 0)

    n_co = 1
    if B < n_tc:                      # multi-TC chip with tiny batch: split Cout
        for nc in (2, 4):
            if _split_ok(nc) and B * nc >= n_tc:
                n_co = nc
                break
    while vmem_needed(Cout // n_co) > budget:               # bound output block
        nxt = next((nc for nc in range(n_co + 1, Cout + 1) if _split_ok(nc)), None)
        if nxt is None:
            break
        n_co = nxt
    # TODO(synk): add haloed output-row tiling and a K-reduction grid axis for
    #             images / weights too large for a single VMEM-resident block.
    tco = Cout // n_co
    vmem_limit = int(min(max(2 * vmem_needed(tco), 32 << 20), budget))

    # ---- specs --------------------------------------------------------------
    x_spec = pl.BlockSpec((None, Cin, F), lambda b, c: (b, 0, 0))
    bias_spec = pl.BlockSpec((tco, 1), lambda b, c: (c, 0))
    out_spec = pl.BlockSpec((None, tco, Mo), lambda b, c: (b, c, 0))

    consts = dict(k=k, cin=Cin, Wp=Wp, Wo=Wo, Ho=Ho, L=L)
    if fuse:
        w_fused = _reorder(jnp.dot(Nw, Cw)).astype(compute_dtype)   # (Cout, Kr)
        kernel = functools.partial(_fused_kernel, **consts)
        w_args = (w_fused,)
        w_specs = [pl.BlockSpec((tco, Kr), lambda b, c: (c, 0))]
    else:
        cw_r = _reorder(Cw).astype(compute_dtype)                   # (r, Kr) bf16
        kernel = functools.partial(_twodot_kernel, **consts)
        w_args = (cw_r, Nw)                                         # Nw stays f32
        w_specs = [pl.BlockSpec((r, Kr), lambda b, c: (0, 0)),
                   pl.BlockSpec((tco, r), lambda b, c: (c, 0))]

    out = pl.pallas_call(
        kernel,
        out_shape=jax.ShapeDtypeStruct((B, Cout, Mo), out_dtype),
        grid_spec=pltpu.PrefetchScalarGridSpec(
            num_scalar_prefetch=0,
            grid=(B, n_co),
            in_specs=[x_spec] + w_specs + [bias_spec],
            out_specs=out_spec,
        ),
        compiler_params=pltpu.CompilerParams(
            dimension_semantics=("parallel", "parallel"),
            vmem_limit_bytes=vmem_limit),
    )(xflat, *w_args, b_col)

    # (B, Cout, Ho*Wo) is already exact NCHW data: the reshape is free.
    return out.reshape(B, Cout, Ho, Wo)


# ----------------------------------------------------------------------------
# Pure-JAX f32 reference: the two convolutions, exactly as in the module.
# ----------------------------------------------------------------------------
def _reference(x, N, C, Sigma, bias, *, kernel_size, padding):
    Cout, r = N.shape
    Cin = x.shape[1]
    k = kernel_size
    s = jnp.sqrt(jnp.abs(Sigma))
    Cw = (s[:, None] * C).reshape(r, Cin, k, k)
    Nw = (N * s[None, :]).reshape(Cout, r, 1, 1)
    dn = ("NCHW", "OIHW", "NCHW")
    y = jax.lax.conv_general_dilated(
        x, Cw, (1, 1), [(padding, padding), (padding, padding)],
        dimension_numbers=dn)
    y = jax.lax.conv_general_dilated(
        y, Nw, (1, 1), [(0, 0), (0, 0)], dimension_numbers=dn)
    if bias is not None:
        y = y + bias.reshape(1, Cout, 1, 1)
    return y


if __name__ == "__main__":
    # Small shapes consistent with the module: NCHW input, channel decomposition.
    B, Cin, Cout, k, pad = 2, 4, 8, 3, 1
    H = W = 16
    K = Cin * k * k

    key = jax.random.PRNGKey(0)
    kx, kn, kc, ks, kb = jax.random.split(key, 5)
    x = jax.random.normal(kx, (B, Cin, H, W), jnp.float32)

    def make_params(r, with_bias):
        # Deterministic init mirroring kaiming_normal_ (fan_in) / normal_.
        Np = jax.random.normal(kn, (Cout, r), jnp.float32) * jnp.sqrt(2.0 / r)
        Cp = jax.random.normal(kc, (r, K), jnp.float32) * jnp.sqrt(2.0 / K)
        Sp = jax.random.normal(ks, (r,), jnp.float32)
        bp = (jax.random.normal(kb, (Cout,), jnp.float32) * 0.1
              if with_bias else None)
        return Np, Cp, Sp, bp

    # Tolerances reflect bf16 streaming of patches/weights with f32 MXU
    # accumulation (the torch reference is fully fp32).
    ATOL = RTOL = 3e-2

    # Case 1: full rank r = min(Cout, Cin*k*k), bias=False (module default)
    #         -> fused single-factor kernel path.
    N1, C1, S1, b1 = make_params(min(Cout, K), with_bias=False)
    y1 = jax.block_until_ready(
        svd_conv2d_forward(x, N1, C1, S1, b1, kernel_size=k, padding=pad))
    y1_ref = jax.block_until_ready(
        _reference(x, N1, C1, S1, b1, kernel_size=k, padding=pad))
    assert y1.shape == (B, Cout, H + 2 * pad - k + 1, W + 2 * pad - k + 1), y1.shape
    assert jnp.allclose(y1, y1_ref, atol=ATOL, rtol=RTOL), \
        float(jnp.max(jnp.abs(y1 - y1_ref)))

    # Case 2: pruned rank (eval-style weights) + bias -> factored two-dot kernel.
    N2, C2, S2, b2 = make_params(4, with_bias=True)
    y2 = jax.block_until_ready(
        svd_conv2d_forward(x, N2, C2, S2, b2, kernel_size=k, padding=pad))
    y2_ref = jax.block_until_ready(
        _reference(x, N2, C2, S2, b2, kernel_size=k, padding=pad))
    assert y2.shape == y1.shape, y2.shape
    assert jnp.allclose(y2, y2_ref, atol=ATOL, rtol=RTOL), \
        float(jnp.max(jnp.abs(y2 - y2_ref)))

    print("KERNEL_OK")
</pallas_src>

<mosaic_0001>
module attributes {stable_mosaic.version = 11 : i64} {
  func.func @_fused_kernel(%arg0: i32, %arg1: i32, %arg2: memref<1x4x324xbf16, #tpu.memory_space<vmem>>, %arg3: memref<8x36xbf16, #tpu.memory_space<vmem>>, %arg4: memref<8x1xf32, #tpu.memory_space<vmem>>, %arg5: memref<1x8x256xf32, #tpu.memory_space<vmem>>) attributes {dimension_semantics = [#tpu.dimension_semantics<parallel>, #tpu.dimension_semantics<parallel>], iteration_bounds = array<i64: 2, 1>, scalar_prefetch = 0 : i64, scratch_operands = 0 : i64, tpu.core_type = #tpu.core_type<tc>, window_params = [{transform_indices = @transform_0, window_bounds = array<i64: 1, 4, 324>}, {transform_indices = @transform_1, window_bounds = array<i64: 8, 36>}, {transform_indices = @transform_2, window_bounds = array<i64: 8, 1>}, {transform_indices = @transform_3, window_bounds = array<i64: 1, 8, 256>}]} {
    %cst = arith.constant 0.000000e+00 : f32
    %0 = vector.broadcast %cst : f32 to vector<8x286xf32>
    %c0 = arith.constant 0 : index
    %c0_0 = arith.constant 0 : index
    %1 = vector.load %arg3[%c0, %c0_0] : memref<8x36xbf16, #tpu.memory_space<vmem>>, vector<8x4xbf16>
    %c0_1 = arith.constant 0 : index
    %c0_2 = arith.constant 0 : index
    %c0_3 = arith.constant 0 : index
    %2 = vector.load %arg2[%c0_1, %c0_2, %c0_3] : memref<1x4x324xbf16, #tpu.memory_space<vmem>>, vector<1x4x286xbf16>
    %3 = vector.shape_cast %2 : vector<1x4x286xbf16> to vector<4x286xbf16>
    %cst_4 = arith.constant dense<0.000000e+00> : vector<8x286xf32>
    %4 = tpu.matmul %1, %3, %cst_4 {dimension_numbers = #tpu.dot_dimension_numbers<[1], [0], [0], [1], [0, 0, 1, 1], [], []>} : vector<8x4xbf16>, vector<4x286xbf16>, vector<8x286xf32> -> vector<8x286xf32>
    %5 = arith.addf %0, %4 : vector<8x286xf32>
    %c0_5 = arith.constant 0 : index
    %c4 = arith.constant 4 : index
    %6 = vector.load %arg3[%c0_5, %c4] : memref<8x36xbf16, #tpu.memory_space<vmem>>, vector<8x4xbf16>
    %c0_6 = arith.constant 0 : index
    %c0_7 = arith.constant 0 : index
    %c1 = arith.constant 1 : index
    %7 = vector.load %arg2[%c0_6, %c0_7, %c1] : memref<1x4x324xbf16, #tpu.memory_space<vmem>>, vector<1x4x286xbf16>
    %8 = vector.shape_cast %7 : vector<1x4x286xbf16> to vector<4x286xbf16>
    %cst_8 = arith.constant dense<0.000000e+00> : vector<8x286xf32>
    %9 = tpu.matmul %6, %8, %cst_8 {dimension_numbers = #tpu.dot_dimension_numbers<[1], [0], [0], [1], [0, 0, 1, 1], [], []>} : vector<8x4xbf16>, vector<4x286xbf16>, vector<8x286xf32> -> vector<8x286xf32>
    %10 = arith.addf %5, %9 : vector<8x286xf32>
    %c0_9 = arith.constant 0 : index
    %c8 = arith.constant 8 : index
    %11 = vector.load %arg3[%c0_9, %c8] : memref<8x36xbf16, #tpu.memory_space<vmem>>, vector<8x4xbf16>
    %c0_10 = arith.constant 0 : index
    %c0_11 = arith.constant 0 : index
    %c2 = arith.constant 2 : index
    %12 = vector.load %arg2[%c0_10, %c0_11, %c2] : memref<1x4x324xbf16, #tpu.memory_space<vmem>>, vector<1x4x286xbf16>
    %13 = vector.shape_cast %12 : vector<1x4x286xbf16> to vector<4x286xbf16>
    %cst_12 = arith.constant dense<0.000000e+00> : vector<8x286xf32>
    %14 = tpu.matmul %11, %13, %cst_12 {dimension_numbers = #tpu.dot_dimension_numbers<[1], [0], [0], [1], [0, 0, 1, 1], [], []>} : vector<8x4xbf16>, vector<4x286xbf16>, vector<8x286xf32> -> vector<8x286xf32>
    %15 = arith.addf %10, %14 : vector<8x286xf32>
    %c0_13 = arith.constant 0 : index
    %c12 = arith.constant 12 : index
    %16 = vector.load %arg3[%c0_13, %c12] : memref<8x36xbf16, #tpu.memory_space<vmem>>, vector<8x4xbf16>
    %c0_14 = arith.constant 0 : index
    %c0_15 = arith.constant 0 : index
    %c18 = arith.constant 18 : index
    %17 = vector.load %arg2[%c0_14, %c0_15, %c18] : memref<1x4x324xbf16, #tpu.memory_space<vmem>>, vector<1x4x286xbf16>
    %18 = vector.shape_cast %17 : vector<1x4x286xbf16> to vector<4x286xbf16>
    %cst_16 = arith.constant dense<0.000000e+00> : vector<8x286xf32>
    %19 = tpu.matmul %16, %18, %cst_16 {dimension_numbers = #tpu.dot_dimension_numbers<[1], [0], [0], [1], [0, 0, 1, 1], [], []>} : vector<8x4xbf16>, vector<4x286xbf16>, vector<8x286xf32> -> vector<8x286xf32>
    %20 = arith.addf %15, %19 : vector<8x286xf32>
    %c0_17 = arith.constant 0 : index
    %c16 = arith.constant 16 : index
    %21 = vector.load %arg3[%c0_17, %c16] : memref<8x36xbf16, #tpu.memory_space<vmem>>, vector<8x4xbf16>
    %c0_18 = arith.constant 0 : index
    %c0_19 = arith.constant 0 : index
    %c19 = arith.constant 19 : index
    %22 = vector.load %arg2[%c0_18, %c0_19, %c19] : memref<1x4x324xbf16, #tpu.memory_space<vmem>>, vector<1x4x286xbf16>
    %23 = vector.shape_cast %22 : vector<1x4x286xbf16> to vector<4x286xbf16>
    %cst_20 = arith.constant dense<0.000000e+00> : vector<8x286xf32>
    %24 = tpu.matmul %21, %23, %cst_20 {dimension_numbers = #tpu.dot_dimension_numbers<[1], [0], [0], [1], [0, 0, 1, 1], [], []>} : vector<8x4xbf16>, vector<4x286xbf16>, vector<8x286xf32> -> vector<8x286xf32>
    %25 = arith.addf %20, %24 : vector<8x286xf32>
    %c0_21 = arith.constant 0 : index
    %c20 = arith.constant 20 : index
    %26 = vector.load %arg3[%c0_21, %c20] : memref<8x36xbf16, #tpu.memory_space<vmem>>, vector<8x4xbf16>
    %c0_22 = arith.constant 0 : index
    %c0_23 = arith.constant 0 : index
    %c20_24 = arith.constant 20 : index
    %27 = vector.load %arg2[%c0_22, %c0_23, %c20_24] : memref<1x4x324xbf16, #tpu.memory_space<vmem>>, vector<1x4x286xbf16>
    %28 = vector.shape_cast %27 : vector<1x4x286xbf16> to vector<4x286xbf16>
    %cst_25 = arith.constant dense<0.000000e+00> : vector<8x286xf32>
    %29 = tpu.matmul %26, %28, %cst_25 {dimension_numbers = #tpu.dot_dimension_numbers<[1], [0], [0], [1], [0, 0, 1, 1], [], []>} : vector<8x4xbf16>, vector<4x286xbf16>, vector<8x286xf32> -> vector<8x286xf32>
    %30 = arith.addf %25, %29 : vector<8x286xf32>
    %c0_26 = arith.constant 0 : index
    %c24 = arith.constant 24 : index
    %31 = vector.load %arg3[%c0_26, %c24] : memref<8x36xbf16, #tpu.memory_space<vmem>>, vector<8x4xbf16>
    %c0_27 = arith.constant 0 : index
    %c0_28 = arith.constant 0 : index
    %c36 = arith.constant 36 : index
    %32 = vector.load %arg2[%c0_27, %c0_28, %c36] : memref<1x4x324xbf16, #tpu.memory_space<vmem>>, vector<1x4x286xbf16>
    %33 = vector.shape_cast %32 : vector<1x4x286xbf16> to vector<4x286xbf16>
    %cst_29 = arith.constant dense<0.000000e+00> : vector<8x286xf32>
    %34 = tpu.matmul %31, %33, %cst_29 {dimension_numbers = #tpu.dot_dimension_numbers<[1], [0], [0], [1], [0, 0, 1, 1], [], []>} : vector<8x4xbf16>, vector<4x286xbf16>, vector<8x286xf32> -> vector<8x286xf32>
    %35 = arith.addf %30, %34 : vector<8x286xf32>
    %c0_30 = arith.constant 0 : index
    %c28 = arith.constant 28 : index
    %36 = vector.load %arg3[%c0_30, %c28] : memref<8x36xbf16, #tpu.memory_space<vmem>>, vector<8x4xbf16>
    %c0_31 = arith.constant 0 : index
    %c0_32 = arith.constant 0 : index
    %c37 = arith.constant 37 : index
    %37 = vector.load %arg2[%c0_31, %c0_32, %c37] : memref<1x4x324xbf16, #tpu.memory_space<vmem>>, vector<1x4x286xbf16>
    %38 = vector.shape_cast %37 : vector<1x4x286xbf16> to vector<4x286xbf16>
    %cst_33 = arith.constant dense<0.000000e+00> : vector<8x286xf32>
    %39 = tpu.matmul %36, %38, %cst_33 {dimension_numbers = #tpu.dot_dimension_numbers<[1], [0], [0], [1], [0, 0, 1, 1], [], []>} : vector<8x4xbf16>, vector<4x286xbf16>, vector<8x286xf32> -> vector<8x286xf32>
    %40 = arith.addf %35, %39 : vector<8x286xf32>
    %c0_34 = arith.constant 0 : index
    %c32 = arith.constant 32 : index
    %41 = vector.load %arg3[%c0_34, %c32] : memref<8x36xbf16, #tpu.memory_space<vmem>>, vector<8x4xbf16>
    %c0_35 = arith.constant 0 : index
    %c0_36 = arith.constant 0 : index
    %c38 = arith.constant 38 : index
    %42 = vector.load %arg2[%c0_35, %c0_36, %c38] : memref<1x4x324xbf16, #tpu.memory_space<vmem>>, vector<1x4x286xbf16>
    %43 = vector.shape_cast %42 : vector<1x4x286xbf16> to vector<4x286xbf16>
    %cst_37 = arith.constant dense<0.000000e+00> : vector<8x286xf32>
    %44 = tpu.matmul %41, %43, %cst_37 {dimension_numbers = #tpu.dot_dimension_numbers<[1], [0], [0], [1], [0, 0, 1, 1], [], []>} : vector<8x4xbf16>, vector<4x286xbf16>, vector<8x286xf32> -> vector<8x286xf32>
    %45 = arith.addf %40, %44 : vector<8x286xf32>
    %c0_38 = arith.constant 0 : index
    %c0_39 = arith.constant 0 : index
    %46 = vector.load %arg4[%c0_38, %c0_39] : memref<8x1xf32, #tpu.memory_space<vmem>>, vector<8x1xf32>
    %47 = vector.broadcast %46 : vector<8x1xf32> to vector<8x286xf32>
    %48 = arith.addf %45, %47 : vector<8x286xf32>
    %49 = vector.extract_strided_slice %48 {offsets = [0, 0], sizes = [8, 16], strides = [1, 1]} : vector<8x286xf32> to vector<8x16xf32>
    %c0_40 = arith.constant 0 : index
    %c0_41 = arith.constant 0 : index
    %c0_42 = arith.constant 0 : index
    %50 = vector.load %arg5[%c0_40, %c0_41, %c0_42] : memref<1x8x256xf32, #tpu.memory_space<vmem>>, vector<1x8x16xf32>
    %51 = vector.shape_cast %50 : vector<1x8x16xf32> to vector<8x16xf32>
    %52 = vector.shape_cast %49 : vector<8x16xf32> to vector<1x8x16xf32>
    tpu.vector_store %arg5[%c0_40, %c0_41, %c0_42], %52 {strides = array<i32>} : memref<1x8x256xf32, #tpu.memory_space<vmem>>, vector<1x8x16xf32>,
    %53 = vector.extract_strided_slice %48 {offsets = [0, 18], sizes = [8, 16], strides = [1, 1]} : vector<8x286xf32> to vector<8x16xf32>
    %c0_43 = arith.constant 0 : index
    %c0_44 = arith.constant 0 : index
    %c16_45 = arith.constant 16 : index
    %54 = vector.load %arg5[%c0_43, %c0_44, %c16_45] : memref<1x8x256xf32, #tpu.memory_space<vmem>>, vector<1x8x16xf32>
    %55 = vector.shape_cast %54 : vector<1x8x16xf32> to vector<8x16xf32>
    %56 = vector.shape_cast %53 : vector<8x16xf32> to vector<1x8x16xf32>
    tpu.vector_store %arg5[%c0_43, %c0_44, %c16_45], %56 {strides = array<i32>} : memref<1x8x256xf32, #tpu.memory_space<vmem>>, vector<1x8x16xf32>,
    %57 = vector.extract_strided_slice %48 {offsets = [0, 36], sizes = [8, 16], strides = [1, 1]} : vector<8x286xf32> to vector<8x16xf32>
    %c0_46 = arith.constant 0 : index
    %c0_47 = arith.constant 0 : index
    %c32_48 = arith.constant 32 : index
    %58 = vector.load %arg5[%c0_46, %c0_47, %c32_48] : memref<1x8x256xf32, #tpu.memory_space<vmem>>, vector<1x8x16xf32>
    %59 = vector.shape_cast %58 : vector<1x8x16xf32> to vector<8x16xf32>
    %60 = vector.shape_cast %57 : vector<8x16xf32> to vector<1x8x16xf32>
    tpu.vector_store %arg5[%c0_46, %c0_47, %c32_48], %60 {strides = array<i32>} : memref<1x8x256xf32, #tpu.memory_space<vmem>>, vector<1x8x16xf32>,
    %61 = vector.extract_strided_slice %48 {offsets = [0, 54], sizes = [8, 16], strides = [1, 1]} : vector<8x286xf32> to vector<8x16xf32>
    %c0_49 = arith.constant 0 : index
    %c0_50 = arith.constant 0 : index
    %c48 = arith.constant 48 : index
    %62 = vector.load %arg5[%c0_49, %c0_50, %c48] : memref<1x8x256xf32, #tpu.memory_space<vmem>>, vector<1x8x16xf32>
    %63 = vector.shape_cast %62 : vector<1x8x16xf32> to vector<8x16xf32>
    %64 = vector.shape_cast %61 : vector<8x16xf32> to vector<1x8x16xf32>
    tpu.vector_store %arg5[%c0_49, %c0_50, %c48], %64 {strides = array<i32>} : memref<1x8x256xf32, #tpu.memory_space<vmem>>, vector<1x8x16xf32>,
    %65 = vector.extract_strided_slice %48 {offsets = [0, 72], sizes = [8, 16], strides = [1, 1]} : vector<8x286xf32> to vector<8x16xf32>
    %c0_51 = arith.constant 0 : index
    %c0_52 = arith.constant 0 : index
    %c64 = arith.constant 64 : index
    %66 = vector.load %arg5[%c0_51, %c0_52, %c64] : memref<1x8x256xf32, #tpu.memory_space<vmem>>, vector<1x8x16xf32>
    %67 = vector.shape_cast %66 : vector<1x8x16xf32> to vector<8x16xf32>
    %68 = vector.shape_cast %65 : vector<8x16xf32> to vector<1x8x16xf32>
    tpu.vector_store %arg5[%c0_51, %c0_52, %c64], %68 {strides = array<i32>} : memref<1x8x256xf32, #tpu.memory_space<vmem>>, vector<1x8x16xf32>,
    %69 = vector.extract_strided_slice %48 {offsets = [0, 90], sizes = [8, 16], strides = [1, 1]} : vector<8x286xf32> to vector<8x16xf32>
    %c0_53 = arith.constant 0 : index
    %c0_54 = arith.constant 0 : index
    %c80 = arith.constant 80 : index
    %70 = vector.load %arg5[%c0_53, %c0_54, %c80] : memref<1x8x256xf32, #tpu.memory_space<vmem>>, vector<1x8x16xf32>
    %71 = vector.shape_cast %70 : vector<1x8x16xf32> to vector<8x16xf32>
    %72 = vector.shape_cast %69 : vector<8x16xf32> to vector<1x8x16xf32>
    tpu.vector_store %arg5[%c0_53, %c0_54, %c80], %72 {strides = array<i32>} : memref<1x8x256xf32, #tpu.memory_space<vmem>>, vector<1x8x16xf32>,
    %73 = vector.extract_strided_slice %48 {offsets = [0, 108], sizes = [8, 16], strides = [1, 1]} : vector<8x286xf32> to vector<8x16xf32>
    %c0_55 = arith.constant 0 : index
    %c0_56 = arith.constant 0 : index
    %c96 = arith.constant 96 : index
    %74 = vector.load %arg5[%c0_55, %c0_56, %c96] : memref<1x8x256xf32, #tpu.memory_space<vmem>>, vector<1x8x16xf32>
    %75 = vector.shape_cast %74 : vector<1x8x16xf32> to vector<8x16xf32>
    %76 = vector.shape_cast %73 : vector<8x16xf32> to vector<1x8x16xf32>
    tpu.vector_store %arg5[%c0_55, %c0_56, %c96], %76 {strides = array<i32>} : memref<1x8x256xf32, #tpu.memory_space<vmem>>, vector<1x8x16xf32>,
    %77 = vector.extract_strided_slice %48 {offsets = [0, 126], sizes = [8, 16], strides = [1, 1]} : vector<8x286xf32> to vector<8x16xf32>
    %c0_57 = arith.constant 0 : index
    %c0_58 = arith.constant 0 : index
    %c112 = arith.constant 112 : index
    %78 = vector.load %arg5[%c0_57, %c0_58, %c112] : memref<1x8x256xf32, #tpu.memory_space<vmem>>, vector<1x8x16xf32>
    %79 = vector.shape_cast %78 : vector<1x8x16xf32> to vector<8x16xf32>
    %80 = vector.shape_cast %77 : vector<8x16xf32> to vector<1x8x16xf32>
    tpu.vector_store %arg5[%c0_57, %c0_58, %c112], %80 {strides = array<i32>} : memref<1x8x256xf32, #tpu.memory_space<vmem>>, vector<1x8x16xf32>,
    %81 = vector.extract_strided_slice %48 {offsets = [0, 144], sizes = [8, 16], strides = [1, 1]} : vector<8x286xf32> to vector<8x16xf32>
    %c0_59 = arith.constant 0 : index
    %c0_60 = arith.constant 0 : index
    %c128 = arith.constant 128 : index
    %82 = vector.load %arg5[%c0_59, %c0_60, %c128] : memref<1x8x256xf32, #tpu.memory_space<vmem>>, vector<1x8x16xf32>
    %83 = vector.shape_cast %82 : vector<1x8x16xf32> to vector<8x16xf32>
    %84 = vector.shape_cast %81 : vector<8x16xf32> to vector<1x8x16xf32>
    tpu.vector_store %arg5[%c0_59, %c0_60, %c128], %84 {strides = array<i32>} : memref<1x8x256xf32, #tpu.memory_space<vmem>>, vector<1x8x16xf32>,
    %85 = vector.extract_strided_slice %48 {offsets = [0, 162], sizes = [8, 16], strides = [1, 1]} : vector<8x286xf32> to vector<8x16xf32>
    %c0_61 = arith.constant 0 : index
    %c0_62 = arith.constant 0 : index
    %c144 = arith.constant 144 : index
    %86 = vector.load %arg5[%c0_61, %c0_62, %c144] : memref<1x8x256xf32, #tpu.memory_space<vmem>>, vector<1x8x16xf32>
    %87 = vector.shape_cast %86 : vector<1x8x16xf32> to vector<8x16xf32>
    %88 = vector.shape_cast %85 : vector<8x16xf32> to vector<1x8x16xf32>
    tpu.vector_store %arg5[%c0_61, %c0_62, %c144], %88 {strides = array<i32>} : memref<1x8x256xf32, #tpu.memory_space<vmem>>, vector<1x8x16xf32>,
    %89 = vector.extract_strided_slice %48 {offsets = [0, 180], sizes = [8, 16], strides = [1, 1]} : vector<8x286xf32> to vector<8x16xf32>
    %c0_63 = arith.constant 0 : index
    %c0_64 = arith.constant 0 : index
    %c160 = arith.constant 160 : index
    %90 = vector.load %arg5[%c0_63, %c0_64, %c160] : memref<1x8x256xf32, #tpu.memory_space<vmem>>, vector<1x8x16xf32>
    %91 = vector.shape_cast %90 : vector<1x8x16xf32> to vector<8x16xf32>
    %92 = vector.shape_cast %89 : vector<8x16xf32> to vector<1x8x16xf32>
    tpu.vector_store %arg5[%c0_63, %c0_64, %c160], %92 {strides = array<i32>} : memref<1x8x256xf32, #tpu.memory_space<vmem>>, vector<1x8x16xf32>,
    %93 = vector.extract_strided_slice %48 {offsets = [0, 198], sizes = [8, 16], strides = [1, 1]} : vector<8x286xf32> to vector<8x16xf32>
    %c0_65 = arith.constant 0 : index
    %c0_66 = arith.constant 0 : index
    %c176 = arith.constant 176 : index
    %94 = vector.load %arg5[%c0_65, %c0_66, %c176] : memref<1x8x256xf32, #tpu.memory_space<vmem>>, vector<1x8x16xf32>
    %95 = vector.shape_cast %94 : vector<1x8x16xf32> to vector<8x16xf32>
    %96 = vector.shape_cast %93 : vector<8x16xf32> to vector<1x8x16xf32>
    tpu.vector_store %arg5[%c0_65, %c0_66, %c176], %96 {strides = array<i32>} : memref<1x8x256xf32, #tpu.memory_space<vmem>>, vector<1x8x16xf32>,
    %97 = vector.extract_strided_slice %48 {offsets = [0, 216], sizes = [8, 16], strides = [1, 1]} : vector<8x286xf32> to vector<8x16xf32>
    %c0_67 = arith.constant 0 : index
    %c0_68 = arith.constant 0 : index
    %c192 = arith.constant 192 : index
    %98 = vector.load %arg5[%c0_67, %c0_68, %c192] : memref<1x8x256xf32, #tpu.memory_space<vmem>>, vector<1x8x16xf32>
    %99 = vector.shape_cast %98 : vector<1x8x16xf32> to vector<8x16xf32>
    %100 = vector.shape_cast %97 : vector<8x16xf32> to vector<1x8x16xf32>
    tpu.vector_store %arg5[%c0_67, %c0_68, %c192], %100 {strides = array<i32>} : memref<1x8x256xf32, #tpu.memory_space<vmem>>, vector<1x8x16xf32>,
    %101 = vector.extract_strided_slice %48 {offsets = [0, 234], sizes = [8, 16], strides = [1, 1]} : vector<8x286xf32> to vector<8x16xf32>
    %c0_69 = arith.constant 0 : index
    %c0_70 = arith.constant 0 : index
    %c208 = arith.constant 208 : index
    %102 = vector.load %arg5[%c0_69, %c0_70, %c208] : memref<1x8x256xf32, #tpu.memory_space<vmem>>, vector<1x8x16xf32>
    %103 = vector.shape_cast %102 : vector<1x8x16xf32> to vector<8x16xf32>
    %104 = vector.shape_cast %101 : vector<8x16xf32> to vector<1x8x16xf32>
    tpu.vector_store %arg5[%c0_69, %c0_70, %c208], %104 {strides = array<i32>} : memref<1x8x256xf32, #tpu.memory_space<vmem>>, vector<1x8x16xf32>,
    %105 = vector.extract_strided_slice %48 {offsets = [0, 252], sizes = [8, 16], strides = [1, 1]} : vector<8x286xf32> to vector<8x16xf32>
    %c0_71 = arith.constant 0 : index
    %c0_72 = arith.constant 0 : index
    %c224 = arith.constant 224 : index
    %106 = vector.load %arg5[%c0_71, %c0_72, %c224] : memref<1x8x256xf32, #tpu.memory_space<vmem>>, vector<1x8x16xf32>
    %107 = vector.shape_cast %106 : vector<1x8x16xf32> to vector<8x16xf32>
    %108 = vector.shape_cast %105 : vector<8x16xf32> to vector<1x8x16xf32>
    tpu.vector_store %arg5[%c0_71, %c0_72, %c224], %108 {strides = array<i32>} : memref<1x8x256xf32, #tpu.memory_space<vmem>>, vector<1x8x16xf32>,
    %109 = vector.extract_strided_slice %48 {offsets = [0, 270], sizes = [8, 16], strides = [1, 1]} : vector<8x286xf32> to vector<8x16xf32>
    %c0_73 = arith.constant 0 : index
    %c0_74 = arith.constant 0 : index
    %c240 = arith.constant 240 : index
    %110 = vector.load %arg5[%c0_73, %c0_74, %c240] : memref<1x8x256xf32, #tpu.memory_space<vmem>>, vector<1x8x16xf32>
    %111 = vector.shape_cast %110 : vector<1x8x16xf32> to vector<8x16xf32>
    %112 = vector.shape_cast %109 : vector<8x16xf32> to vector<1x8x16xf32>
    tpu.vector_store %arg5[%c0_73, %c0_74, %c240], %112 {strides = array<i32>} : memref<1x8x256xf32, #tpu.memory_space<vmem>>, vector<1x8x16xf32>,
    return
  }
  func.func @transform_0(%arg0: i32, %arg1: i32) -> (i32, i32, i32) {
    %c0_i32 = arith.constant 0 : i32
    %c0_i32_0 = arith.constant 0 : i32
    %c0_i32_1 = arith.constant 0 : i32
    return %arg0, %c0_i32, %c0_i32_0 : i32, i32, i32
  }
  func.func @transform_1(%arg0: i32, %arg1: i32) -> (i32, i32) {
    %c0_i32 = arith.constant 0 : i32
    %c0_i32_0 = arith.constant 0 : i32
    return %arg1, %c0_i32 : i32, i32
  }
  func.func @transform_2(%arg0: i32, %arg1: i32) -> (i32, i32) {
    %c0_i32 = arith.constant 0 : i32
    %c0_i32_0 = arith.constant 0 : i32
    return %arg1, %c0_i32 : i32, i32
  }
  func.func @transform_3(%arg0: i32, %arg1: i32) -> (i32, i32, i32) {
    %c0_i32 = arith.constant 0 : i32
    %c0_i32_0 = arith.constant 0 : i32
    return %arg0, %arg1, %c0_i32 : i32, i32, i32
  }
}

</mosaic_0001>

<bundles_post_ra>
// kernel: tpu_custom_call.1
= control target key start
LH: loop header
LB: loop body
LE: loop exit
PB: predicated region body
PF: predicated region fallthrough
CT: control target
= control target key end

     0   :  { %8 = vsyncpa [#allocation3], 0  ;;  %s2354_s0 = inlined_call_operand.hbm [shape: bf16[2,4,324], index: 0, kind: input, shape index: {}]   ;;  %s2355_s1 = inlined_call_operand.vmem [shape: bf16[8,36], index: 1, kind: input, shape index: {}]   ;;  %s2356_s2 = inlined_call_operand.vmem [shape: f32[8,1], index: 2, kind: input, shape index: {}]   ;;  %s2357_s3 = inlined_call_operand.hbm [shape: f32[2,8,256], index: 3, kind: output, shape index: {}]  }
   0x1   :  { %10 = vsyncpa [#allocation3 + $0x1], 0 }
   0x2   :  { %11 = vsyncpa [#allocation4], 0 }
   0x3   :  { %13 = vsyncpa [#allocation4 + $0x1], 0  ;;  %s1967_s12 = smov 0   ;;  %s1969_s13 = smov 0  }
   0x4   :  { %s1971_s14 = smov 0   ;;  %s1973_s15 = smov 0  }
   0x5   :  { %s1975_s16 = smov 0   ;;  %s1977_s17 = smov 0  }
   0x6 LB: > { %s1577_s18 = sadd.s32 4294967295, %s1918_s17   ;;  %s1578_s19 = sadd.s32 4294967294, %s1918_s17   ;;  %s1918_s17 = sphi %s1977_s17, %s19_s17   ;;  %s1914_s16 = sphi %s1975_s16, %s2372_s16   ;;  %s1910_s15 = sphi %s1973_s15, %s2371_s15   ;;  %s1906_s14 = sphi %s1971_s14, %s2370_s14   ;;  %s1902_s13 = sphi %s1969_s13, %s2369_s13   ;;  %s1898_s12 = sphi %s1967_s12, %s2368_s12  }
   0x7   : > { %s31_s20 = sadd.s32 1, %s1914_s16  ;;  %s38_s21 = sadd.s32 1, %s1906_s14 }
   0x8   : > { %p33_p0 = scmp.ge.s32.totalorder %s31_s20, 2  ;;  %p45_p1 = scmp.ne.s32.totalorder %s1906_s14, %s1902_s13 }
   0x9   : > { %p46_p2 = scmp.eq.s32.totalorder %s1918_s17, 0  ;;  %p51_p3 = scmp.ne.s32.totalorder %s1902_s13, %s1898_s12 }
   0xa   : > { %s2374_s20 = smov (%p33_p0, %s31_s20), 0  ;;  %p52_p5 = scmp.eq.s32.totalorder %s1577_s18, 0 }
   0xb   : > { %p2008_p4 = por %p46_p2, %p45_p1  ;;  %s35_s23 = ssub.s32 %s1914_s16, %s2374_s20 }
   0xc   : > { %p129_p6 = scmp.eq.s32.totalorder %s1577_s18, 1  ;;  %p36_p7 = scmp.eq.s32.totalorder %s35_s23, 0 }
   0xd   : > { %p2014_p8 = por %p52_p5, %p51_p3  ;;  %p135_p10 = scmp.eq.s32.totalorder %s1578_s19, 1 }
   0xe   : > { %p2018_p9 = por %p129_p6, %p45_p1  ;;  %p1714_p13 = scmp.lt.s32.totalorder %s1918_s17, 2 }
   0xf   : > { %s2023_s26 = scalar_select %p36_p7, %s1906_s14, %s38_s21  }
  0x10   : > { %s2361_s25 = scalar_select %p2018_p9, 1, 0 }
  0x11   : > { %p2025_p11 = por %p135_p10, %p51_p3  ;;  %s169_s28 = sand.u32 1, %s1906_s14  }
  0x12   : > { %s1699_s29 = smul.u32 6, %s169_s28  ;;  %p2035_p0 = pnand %p1714_p13, %p2008_p4 }
  0x13   : > { %s2362_s27 = scalar_select %p2025_p11, 1, 0 }
  0x14   : > { %s1700_s30 = smul.u32 96, %s1914_s16  ;;  %s173_s8 = scalar_lea.vmem [#allocation2], %s1699_s29 }
  0x15   : > { %s181_s9 = sshll.u32 %s173_s8, 4  ;;  %s170_s10 = scalar_lea.sflag [#allocation3], %s169_s28  ;;  %s2045_s9 = int_to_ptr.vmem [resolvable:$true] %s181_s9 }
  0x16   : > { %s2043_s7 = scalar_lea.hbm %s2354_s0, %s1700_s30  ;;  %p1808_p3 = pneg %p2035_p0 }
  0x17   : > { %s1806_s11 = scalar_lea.hbm %s2043_s7, 96  ;;  %s1811_s21 = scalar_lea.hbm %s2354_s0, 192 }
  0x18   : > { %p1807_p2 = scmp.ne.s32.totalorder %s2043_s7, %s1806_s11  ;;  %p1812_p6 = scmp.lt.u32.totalorder %s2043_s7, %s2354_s0 }
  0x19   : > { %p1813_p7 = scmp.lt.u32.totalorder %s1811_s21, %s1806_s11  ;;  %p1815_p13 = scmp.lt.u32.totalorder %s1806_s11, %s2043_s7 }
  0x1a   : > { %p1809_p4 = pnand %p1808_p3, %p1807_p2 }
  0x1b   : > { %p1814_p10 = por %p1813_p7, %p1812_p6 }
  0x1c   : > { %p1810_p5 = pneg %p1809_p4 }
  0x1d   : > { %p1816_p12 = por %p1815_p13, %p1814_p10 }
  0x1f   : > { %p1817_p1 = pnand %p1816_p12, %p1810_p5 }
  0x21   : > { %1820 = shalt.err (!%p1817_p1)
}
  0x22   : > { %s1821_s28 = scalar_lea.vmem %s2045_s9, 96  ;;  %s1920_s29 = smov [#allocation2]  }
  0x23   : > { %p1822_p2 = scmp.ne.s32.totalorder %s2045_s9, %s1821_s28  ;;  %s1826_s30 = sshll.u32 %s1920_s29, 4  ;;  %s1827_s30 = int_to_ptr.vmem [resolvable:$false] %s1826_s30 }
  0x24   : > { %s1828_s5 = scalar_lea.vmem %s1827_s30, 192  ;;  %p1829_p9 = scmp.lt.s32.totalorder %s2045_s9, %s1827_s30 }
  0x25   : > { %p1824_p4 = pnand %p1822_p2, %p1808_p3  ;;  %p1830_p6 = scmp.lt.s32.totalorder %s1828_s5, %s1821_s28 }
  0x27   : > { %p1825_p11 = pneg %p1824_p4  ;;  %p1831_p7 = por %p1830_p6, %p1829_p9 }
  0x29   : > { %p1832_p10 = pnand %p1831_p7, %p1825_p11 }
  0x2b   : > { %1835 = shalt.err (!%p1832_p10)
}
  0x2c   : > { %1709 = dma.hbm_to_vmem [thread:$0]  (!%p2035_p0), %s2043_s7, 96, %s2045_s9, %s170_s10  }
  0x2d   : > { %p186_p12 = scmp.lt.s32.totalorder %s1918_s17, 3  ;;  %p2364_p1 = scmp.ge.s32.totalorder %s1918_s17, 1 }
  0x2f   : > { %p187_p3 = pnand %p2364_p1, %p186_p12 }
  0x30   : > { %s2076_s6 = sand.u32 (!%p187_p3), 1, %s1902_s13  }
  0x31   : > { %190 = sbr.rel (%p187_p3) target bundleno = 632 (0x278), region = 32  ;;  %s193_s11 = scalar_lea.sflag (!%p187_p3), [#allocation3], %s2076_s6 }
  0x32   : > { %s1701_s8 = smul.u32 (!%p187_p3), 6, %s2076_s6 }
  0x34   : > { %s2080_s18 = scalar_lea.vmem (!%p187_p3), [#allocation2], %s1701_s8 }
  0x38   : > { %1889 = dma.done.wait (%p2014_p8), %s193_s11, 96  }
  0x39   : > { %1891 = vsyncadd (%p2014_p8), %s193_s11, 4294967200  ;;  %v248_v0 = vlaneseq  ;;  %v1921_v1 = vmov 1983009808   ;;  %v1922_v3 = vmov 0.0   ;;  %vm1923_vm0 = vmmov 0   ;;  %s1925_s7 = smov 127  }
  0x3a   : > { %v246_v2 = vunpack.c.l.s4 %v1921_v1  ;;  %1645 = vmatprep.subr.bf16.mxu1 %v1922_v3  ;;  %1647 = vmatprep.mubr.msk.bf16.mxu1 %vm1923_vm0, %v1922_v3  ;;  %v1924_v6 = vmov 0   ;;  %v237_v8 = vld [vmem:[%s2080_s18] sm:$0x3f]  ;;  %s1926_s9 = smov 124   ;;  %s1927_s10 = smov 126   ;;  %vm273_vm1 = vcmask 1041408  }
  0x3b   : > { %v249_v4 = vshrl.u32 %v248_v0, 7  ;;  %315 = vmatprep.mubr.bf16.mxu0 %v1924_v6  ;;  %1789 = vset.pattern.permute.xlu0 %v1924_v6  ;;  %v244_v10 = vcombine.high %v237_v8, %v237_v8  ;;  %v2100_v11 = vld [vmem:[%s2355_s1] sm:$0xf]  ;;  %s1928_s22 = smov 120   ;;  %s1929_s23 = smov 110   ;;  %vm266_vm2 = vcmask 1039360  }
  0x3c   : > { %v247_v5 = vunpack.c.0.s8 %v246_v2  ;;  %v458_v14 = vld [vmem:[%s2080_s18] sm:$0x3f]  ;;  %v1586_v15 = vcombine.low %v2100_v11, %v2100_v11  ;;  %s1930_s30 = smov 116   ;;  %s1931_s5 = smov 109   ;;  %vm269_vm3 = vcmask 31744   ;;  %vm487_vm4 = vcmask 1031168  }
  0x3d   : > { %v465_v17 = vcombine.high %v458_v14, %v458_v14  ;;  %v587_v20 = vld [vmem:[%s2080_s18] sm:$0x3f]  ;;  %s1932_s24 = smov 112   ;;  %s1933_s4 = smov 108   ;;  %vm616_vm5 = vcmask 900096   ;;  %vm745_vm6 = vcmask 891904  }
  0x3e   : > { %v2091_v7 = vsub.s32 %v247_v5, %v249_v4  ;;  %v1793_v21 = vld [vmem:[%s2355_s1] ss:$0 sps:$4 sm:$0xff]   ;;  %v594_v23 = vcombine.high %v587_v20, %v587_v20  ;;  %s1934_s21 = smov 92   ;;  %s1936_s8 = smov 91   ;;  %vm874_vm7 = vcmask 883712   ;;  %vm1003_vm8 = vcmask 752640  }
  0x3f   : > { %v716_v26 = vld [vmem:[%s2080_s18] sm:$0x3f]  ;;  %s1937_s19 = smov 100   ;;  %vm1132_vm9 = vcmask 744448   ;;  %vm1261_vm10 = vcmask 736256   ;;  %vm1369_vm11 = vcmask 130048  }
  0x40   : > { %v2095_v9 = vrot.slane %v237_v8, %v2091_v7  ;;  %v2104_v12 = vrot.slane %v244_v10, %v2091_v7  ;;  %v472_v16 = vrot.slane %v458_v14, %v2091_v7  ;;  %v479_v19 = vrot.slane %v465_v17, %v2091_v7  ;;  %v1795_v27 = vld [vmem:[%s2355_s1] ss:$0 sps:$4 sm:$0xff]   ;;  %s1940_s28 = smov 114   ;;  %s1942_s29 = smov 106  }
  0x41   : > { %v601_v22 = vrot.slane %v587_v20, %v2091_v7  ;;  %v608_v25 = vrot.slane %v594_v23, %v2091_v7  ;;  %v730_v28 = vrot.slane %v716_v26, %v2091_v7  ;;  %v723_v29 = vcombine.high %v716_v26, %v716_v26  ;;  %v845_v32 = vld [vmem:[%s2080_s18] sm:$0x3f]  ;;  %s1944_s11 = smov 102   ;;  %p2365_p9 = scmp.ne.s32.totalorder %s2361_s25, 0 }
  0x42   : > { %260 = vrot.lane.b32.xlu0 %v2095_v9, %s1925_s7  ;;  %v2108_v13 = vcombine.high %v2095_v9, %v2095_v9  ;;  %264 = vrot.lane.b32.xlu1 %v2104_v12, %s1925_s7  ;;  %v480_v18 = vcombine.high %v472_v16, %v472_v16  ;;  %v1797_v33 = vld [vmem:[%s2355_s1] ss:$0 sps:$4 sm:$0xff]   ;;  %v859_v34 = vrot.slane %v845_v32, %v2091_v7  ;;  %v374_v0 = vsel %vm273_vm1, %v2104_v12, 0 }
  0x43   : > { %v609_v24 = vcombine.high %v601_v22, %v601_v22  ;;  %v738_v30 = vcombine.high %v730_v28, %v730_v28  ;;  %v737_v31 = vrot.slane %v723_v29, %v2091_v7  ;;  %v852_v35 = vcombine.high %v845_v32, %v845_v32  ;;  %v974_v38 = vld [vmem:[%s2080_s18] sm:$0x3f] }
  0x44   : > { %v867_v36 = vcombine.high %v859_v34, %v859_v34  ;;  %v1799_v39 = vld [vmem:[%s2355_s1] ss:$0 sps:$4 sm:$0xff]   ;;  %v988_v40 = vrot.slane %v974_v38, %v2091_v7  ;;  %v981_v41 = vcombine.high %v974_v38, %v974_v38  ;;  %v368_v5 = vsel %vm273_vm1, %v2095_v9, 0 }
  0x45   : > { %v866_v37 = vrot.slane %v852_v35, %v2091_v7  ;;  %v1103_v44 = vld [vmem:[%s2080_s18] sm:$0x3f]  ;;  %vm1375_vm12 = vcmask 261248   ;;  %vm1380_vm13 = vcmask 392448   ;;  %vm1385_vm14 = vcmask 523648  }
  0x46   : > { %262 = vrot.lane.b32.xlu0 %v2108_v13, %s1925_s7  ;;  %241 = vrot.lane.b32.xlu1 %v1586_v15, %s1926_s9  ;;  %v996_v42 = vcombine.high %v988_v40, %v988_v40  ;;  %v995_v43 = vrot.slane %v981_v41, %v2091_v7  ;;  %v1801_v45 = vld [vmem:[%s2355_s1] ss:$0 sps:$4 sm:$0xff]   ;;  %v1117_v46 = vrot.slane %v1103_v44, %v2091_v7  ;;  %s1585_s7 = sshll.u32 %s2076_s6, 4  ;;  %vm1390_vm15 = vcmask 654848  }
  0x47   : > { %v1110_v47 = vcombine.high %v1103_v44, %v1103_v44  ;;  %v1232_v50 = vld [vmem:[%s2080_s18] sm:$0x3f]  ;;  %s1941_s18 = smov 122  }
  0x48   : > { %v1125_v48 = vcombine.high %v1117_v46, %v1117_v46  ;;  %v1803_v51 = vld [vmem:[%s2355_s1] ss:$0 sps:$4 sm:$0xff]   ;;  %v1246_v52 = vrot.slane %v1232_v50, %v2091_v7  ;;  %v1239_v53 = vcombine.high %v1232_v50, %v1232_v50 }
  0x49   : > { %v1124_v49 = vrot.slane %v1110_v47, %v2091_v7  ;;  %v1805_v56 = vld [vmem:[%s2355_s1] ss:$0 sps:$4 sm:$0xff]  }
  0x4a   : > { %481 = vrot.lane.b32.xlu0 %v472_v16, %s1927_s10  ;;  %483 = vrot.lane.b32.xlu1 %v480_v18, %s1927_s10  ;;  %v1254_v54 = vcombine.high %v1246_v52, %v1246_v52  ;;  %v1253_v55 = vrot.slane %v1239_v53, %v2091_v7  ;;  %v1360_v57 = vld [vmem:[%s2356_s2] sm:$0xff] }
  0x4e   : > { %485 = vrot.lane.b32.xlu0 %v479_v19, %s1927_s10  ;;  %462 = vrot.lane.b32.xlu1 %v1793_v21, %s1928_s22 }
  0x52   : > { %610 = vrot.lane.b32.xlu0 %v601_v22, %s1929_s23  ;;  %612 = vrot.lane.b32.xlu1 %v609_v24, %s1929_s23 }
  0x56   : > { %614 = vrot.lane.b32.xlu0 %v608_v25, %s1929_s23  ;;  %591 = vrot.lane.b32.xlu1 %v1795_v27, %s1930_s30 }
  0x5a   : > { %739 = vrot.lane.b32.xlu0 %v730_v28, %s1931_s5  ;;  %741 = vrot.lane.b32.xlu1 %v738_v30, %s1931_s5 }
  0x5e   : > { %743 = vrot.lane.b32.xlu0 %v737_v31, %s1931_s5  ;;  %720 = vrot.lane.b32.xlu1 %v1797_v33, %s1932_s24  ;;  %s1935_s5 = smov 104  }
  0x62   : > { %868 = vrot.lane.b32.xlu0 %v859_v34, %s1933_s4  ;;  %870 = vrot.lane.b32.xlu1 %v867_v36, %s1933_s4 }
  0x66   : > { %872 = vrot.lane.b32.xlu0 %v866_v37, %s1933_s4  ;;  %849 = vrot.lane.b32.xlu1 %v1799_v39, %s1933_s4 }
  0x6a   : > { %997 = vrot.lane.b32.xlu0 %v988_v40, %s1934_s21  ;;  %999 = vrot.lane.b32.xlu1 %v996_v42, %s1934_s21 }
  0x6e   : > { %1001 = vrot.lane.b32.xlu0 %v995_v43, %s1934_s21  ;;  %978 = vrot.lane.b32.xlu1 %v1801_v45, %s1935_s5  ;;  %s1938_s21 = smov 90  }
  0x72   : > { %1126 = vrot.lane.b32.xlu0 %v1117_v46, %s1936_s8  ;;  %1128 = vrot.lane.b32.xlu1 %v1125_v48, %s1936_s8 }
  0x76   : > { %1130 = vrot.lane.b32.xlu0 %v1124_v49, %s1936_s8  ;;  %1107 = vrot.lane.b32.xlu1 %v1803_v51, %s1937_s19  ;;  %s1939_s8 = smov 96  }
  0x7a   : > { %1255 = vrot.lane.b32.xlu0 %v1246_v52, %s1938_s21  ;;  %1257 = vrot.lane.b32.xlu1 %v1254_v54, %s1938_s21 }
  0x7e   : > { %1259 = vrot.lane.b32.xlu0 %v1253_v55, %s1938_s21  ;;  %1236 = vrot.lane.b32.xlu1 %v1805_v56, %s1939_s8  ;;  %s2260_s21 = scalar_lea.vmem [#allocation5], %s1585_s7 }
  0x82   : > { %1363 = vperm.xlu0 %1789, %v1360_v57  }
  0xb4   : > { %v261_v58 = vpop.permute.xlu0 %260  ;;  %v265_v59 = vpop.permute.xlu1 %264 }
  0xb5   : > { %v281_v60 = vsel %vm273_vm1, %v265_v59, 0 }
  0xb6   : > { %1646 = vmatpush3.bf16.msra.mxu1 %v281_v60 }
  0xb7   : > { %1651 = vmatprep.subr.bf16.mxu1 %v1922_v3 }
  0xb8   : > { %v263_v61 = vpop.permute.xlu0 %262  ;;  %v242_v1 = vpop.permute.xlu1 %241 }
  0xb9   : > { %v268_v62 = vsel %vm266_vm2, %v263_v61, %v265_v59  ;;  %v267_v63 = vsel %vm266_vm2, %v261_v58, %v263_v61  ;;  %1648 = vmatmul.mubr.msk.bf16.vlgmr.msra.gmra.mrb[0].mxu1 %vm269_vm3, %v242_v1  ;;  %vm1441_vm2 = vcmask 818176  }
  0xba   : > { %1587 = vmatprep.subr.msk.bf16.mxu0 %vm273_vm1, %v268_v62  ;;  %v275_v2 = vsel %vm273_vm1, %v267_v63, 0  ;;  %1652 = vmatpush3.bf16.msra.mxu1 %v374_v0 }
  0xbb   : > { %284 = vmatpush1.bf16.msra.mxu0 %v275_v2  ;;  %1653 = vmatprep.mubr.msk.bf16.mxu1 %vm1923_vm0, %v1922_v3 }
  0xbc   : > { %1590 = vmatprep.subr.msk.bf16.mxu0 %vm273_vm1, %v2108_v13  ;;  %v482_v4 = vpop.permute.xlu0 %481  ;;  %1657 = vmatprep.subr.bf16.mxu1 %v1922_v3  ;;  %v484_v7 = vpop.permute.xlu1 %483 }
  0xbd   : > { %v488_v10 = vsel %vm487_vm4, %v482_v4, %v484_v7 }
  0xbe   : > { %1588 = vmatmul.mubr.msk.bf16.vlgmr.msra.gmra.mrb[0].mxu0 %vm269_vm3, %v242_v1  ;;  %v494_v9 = vsel %vm273_vm1, %v488_v10, 0 }
  0xbf   : > { %377 = vmatpush1.bf16.msra.mxu0 %v368_v5  ;;  %408 = vmatprep.mubr.bf16.mxu0 %v1924_v6 }
  0xc0   : > { %v486_v8 = vpop.permute.xlu0 %485  ;;  %v463_v14 = vpop.permute.xlu1 %462 }
  0xc1   : > { %v489_v12 = vsel %vm487_vm4, %v484_v7, %v486_v8  ;;  %v500_v13 = vsel %vm273_vm1, %v486_v8, 0  ;;  %1654 = vmatmul.mubr.msk.bf16.vlgmr.msra.gmra.mrb[4].mxu1 %vm269_vm3, %v2100_v11  ;;  %vm1407_vm4 = vcmask 932864  }
  0xc2   : > { %1594 = vmatprep.subr.msk.bf16.mxu0 %vm273_vm1, %v489_v12  ;;  %1658 = vmatpush3.bf16.msra.mxu1 %v500_v13 }
  0xc3   : > { %1659 = vmatprep.mubr.msk.bf16.mxu1 %vm1923_vm0, %v1922_v3  ;;  %1663 = vmatprep.subr.bf16.mxu1 %v1922_v3 }
  0xc4   : > { %v611_v15 = vpop.permute.xlu0 %610  ;;  %v613_v16 = vpop.permute.xlu1 %612 }
  0xc5   : > { %v617_v18 = vsel %vm616_vm5, %v611_v15, %v613_v16 }
  0xc6   : > { %1591 = vmatmul.mubr.msk.bf16.vlgmr.msra.gmra.mrb[4].mxu0 %vm269_vm3, %v2100_v11  ;;  %v623_v22 = vsel %vm273_vm1, %v617_v18, 0 }
  0xc7   : > { %503 = vmatpush1.bf16.msra.mxu0 %v494_v9  ;;  %534 = vmatprep.mubr.bf16.mxu0 %v1924_v6 }
  0xc8   : > { %v615_v17 = vpop.permute.xlu0 %614  ;;  %v592_v21 = vpop.permute.xlu1 %591 }
  0xc9   : > { %v618_v19 = vsel %vm616_vm5, %v613_v16, %v615_v17  ;;  %v629_v20 = vsel %vm273_vm1, %v615_v17, 0  ;;  %1660 = vmatmul.mubr.msk.bf16.vlgmr.msra.gmra.mrb[8].mxu1 %vm269_vm3, %v463_v14 }
  0xca   : > { %1598 = vmatprep.subr.msk.bf16.mxu0 %vm273_vm1, %v618_v19  ;;  %1664 = vmatpush3.bf16.msra.mxu1 %v629_v20 }
  0xcb   : > { %1665 = vmatprep.mubr.msk.bf16.mxu1 %vm1923_vm0, %v1922_v3  ;;  %1669 = vmatprep.subr.bf16.mxu1 %v1922_v3 }
  0xcc   : > { %v740_v23 = vpop.permute.xlu0 %739  ;;  %v742_v11 = vpop.permute.xlu1 %741 }
  0xcd   : > { %v746_v25 = vsel %vm745_vm6, %v740_v23, %v742_v11 }
  0xce   : > { %1595 = vmatmul.mubr.msk.bf16.vlgmr.msra.gmra.mrb[8].mxu0 %vm269_vm3, %v463_v14  ;;  %v752_v29 = vsel %vm273_vm1, %v746_v25, 0 }
  0xcf   : > { %632 = vmatpush1.bf16.msra.mxu0 %v623_v22  ;;  %663 = vmatprep.mubr.bf16.mxu0 %v1924_v6 }
  0xd0   : > { %v744_v24 = vpop.permute.xlu0 %743  ;;  %v721_v28 = vpop.permute.xlu1 %720 }
  0xd1   : > { %v747_v26 = vsel %vm745_vm6, %v742_v11, %v744_v24  ;;  %v758_v27 = vsel %vm273_vm1, %v744_v24, 0  ;;  %1666 = vmatmul.mubr.msk.bf16.vlgmr.msra.gmra.mrb[12].mxu1 %vm269_vm3, %v592_v21 }
  0xd2   : > { %1602 = vmatprep.subr.msk.bf16.mxu0 %vm273_vm1, %v747_v26  ;;  %1670 = vmatpush3.bf16.msra.mxu1 %v758_v27 }
  0xd3   : > { %1671 = vmatprep.mubr.msk.bf16.mxu1 %vm1923_vm0, %v1922_v3  ;;  %1675 = vmatprep.subr.bf16.mxu1 %v1922_v3 }
  0xd4   : > { %v869_v30 = vpop.permute.xlu0 %868  ;;  %v871_v31 = vpop.permute.xlu1 %870 }
  0xd5   : > { %v875_v33 = vsel %vm874_vm7, %v869_v30, %v871_v31 }
  0xd6   : > { %1599 = vmatmul.mubr.msk.bf16.vlgmr.msra.gmra.mrb[12].mxu0 %vm269_vm3, %v592_v21  ;;  %v881_v37 = vsel %vm273_vm1, %v875_v33, 0 }
  0xd7   : > { %761 = vmatpush1.bf16.msra.mxu0 %v752_v29  ;;  %792 = vmatprep.mubr.bf16.mxu0 %v1924_v6 }
  0xd8   : > { %v873_v32 = vpop.permute.xlu0 %872  ;;  %v850_v36 = vpop.permute.xlu1 %849 }
  0xd9   : > { %v876_v34 = vsel %vm874_vm7, %v871_v31, %v873_v32  ;;  %v887_v35 = vsel %vm273_vm1, %v873_v32, 0  ;;  %1672 = vmatmul.mubr.msk.bf16.vlgmr.msra.gmra.mrb[16].mxu1 %vm269_vm3, %v721_v28 }
  0xda   : > { %1606 = vmatprep.subr.msk.bf16.mxu0 %vm273_vm1, %v876_v34  ;;  %1676 = vmatpush3.bf16.msra.mxu1 %v887_v35 }
  0xdb   : > { %1677 = vmatprep.mubr.msk.bf16.mxu1 %vm1923_vm0, %v1922_v3  ;;  %1681 = vmatprep.subr.bf16.mxu1 %v1922_v3 }
  0xdc   : > { %v998_v38 = vpop.permute.xlu0 %997  ;;  %v1000_v39 = vpop.permute.xlu1 %999 }
  0xdd   : > { %v1004_v41 = vsel %vm1003_vm8, %v998_v38, %v1000_v39 }
  0xde   : > { %1603 = vmatmul.mubr.msk.bf16.vlgmr.msra.gmra.mrb[16].mxu0 %vm269_vm3, %v721_v28  ;;  %v1010_v45 = vsel %vm273_vm1, %v1004_v41, 0 }
  0xdf   : > { %890 = vmatpush1.bf16.msra.mxu0 %v881_v37  ;;  %921 = vmatprep.mubr.bf16.mxu0 %v1924_v6 }
  0xe0   : > { %v1002_v40 = vpop.permute.xlu0 %1001  ;;  %v979_v44 = vpop.permute.xlu1 %978 }
  0xe1   : > { %v1005_v42 = vsel %vm1003_vm8, %v1000_v39, %v1002_v40  ;;  %v1016_v43 = vsel %vm273_vm1, %v1002_v40, 0  ;;  %1678 = vmatmul.mubr.msk.bf16.vlgmr.msra.gmra.mrb[20].mxu1 %vm269_vm3, %v850_v36 }
  0xe2   : > { %1610 = vmatprep.subr.msk.bf16.mxu0 %vm273_vm1, %v1005_v42  ;;  %1682 = vmatpush3.bf16.msra.mxu1 %v1016_v43 }
  0xe3   : > { %1683 = vmatprep.mubr.msk.bf16.mxu1 %vm1923_vm0, %v1922_v3  ;;  %1687 = vmatprep.subr.bf16.mxu1 %v1922_v3 }
  0xe4   : > { %v1127_v46 = vpop.permute.xlu0 %1126  ;;  %v1129_v47 = vpop.permute.xlu1 %1128 }
  0xe5   : > { %v1133_v49 = vsel %vm1132_vm9, %v1127_v46, %v1129_v47 }
  0xe6   : > { %1607 = vmatmul.mubr.msk.bf16.vlgmr.msra.gmra.mrb[20].mxu0 %vm269_vm3, %v850_v36  ;;  %v1139_v53 = vsel %vm273_vm1, %v1133_v49, 0 }
  0xe7   : > { %1019 = vmatpush1.bf16.msra.mxu0 %v1010_v45  ;;  %1050 = vmatprep.mubr.bf16.mxu0 %v1924_v6 }
  0xe8   : > { %v1131_v48 = vpop.permute.xlu0 %1130  ;;  %v1108_v52 = vpop.permute.xlu1 %1107 }
  0xe9   : > { %v1134_v50 = vsel %vm1132_vm9, %v1129_v47, %v1131_v48  ;;  %v1145_v51 = vsel %vm273_vm1, %v1131_v48, 0  ;;  %1684 = vmatmul.mubr.msk.bf16.vlgmr.msra.gmra.mrb[24].mxu1 %vm269_vm3, %v979_v44 }
  0xea   : > { %1614 = vmatprep.subr.msk.bf16.mxu0 %vm273_vm1, %v1134_v50  ;;  %1688 = vmatpush3.bf16.msra.mxu1 %v1145_v51 }
  0xeb   : > { %1689 = vmatprep.mubr.msk.bf16.mxu1 %vm1923_vm0, %v1922_v3  ;;  %1693 = vmatprep.subr.bf16.mxu1 %v1922_v3 }
  0xec   : > { %v1256_v54 = vpop.permute.xlu0 %1255  ;;  %v1258_v55 = vpop.permute.xlu1 %1257 }
  0xed   : > { %v1262_v57 = vsel %vm1261_vm10, %v1256_v54, %v1258_v55 }
  0xee   : > { %1611 = vmatmul.mubr.msk.bf16.vlgmr.msra.gmra.mrb[24].mxu0 %vm269_vm3, %v979_v44  ;;  %v1268_v60 = vsel %vm273_vm1, %v1262_v57, 0 }
  0xef   : > { %1148 = vmatpush1.bf16.msra.mxu0 %v1139_v53  ;;  %1179 = vmatprep.mubr.bf16.mxu0 %v1924_v6 }
  0xf0   : > { %v1260_v56 = vpop.permute.xlu0 %1259  ;;  %v1237_v61 = vpop.permute.xlu1 %1236 }
  0xf1   : > { %v1263_v58 = vsel %vm1261_vm10, %v1258_v55, %v1260_v56  ;;  %v1274_v59 = vsel %vm273_vm1, %v1260_v56, 0  ;;  %1690 = vmatmul.mubr.msk.bf16.vlgmr.msra.gmra.mrb[28].mxu1 %vm269_vm3, %v1108_v52 }
  0xf2   : > { %1618 = vmatprep.subr.msk.bf16.mxu0 %vm273_vm1, %v1263_v58  ;;  %1694 = vmatpush3.bf16.msra.mxu1 %v1274_v59  ;;  %vm1400_vm1 = vcmask 917248  }
  0xf3   : > { %1695 = vmatprep.mubr.msk.bf16.mxu1 %vm1923_vm0, %v1922_v3  ;;  %vm1395_vm0 = vcmask 786048  }
  0xf6   : > { %1615 = vmatmul.mubr.msk.bf16.vlgmr.msra.gmra.mrb[28].mxu0 %vm269_vm3, %v1108_v52 }
  0xf7   : > { %1277 = vmatpush1.bf16.msra.mxu0 %v1268_v60  ;;  %1308 = vmatprep.mubr.bf16.mxu0 %v1924_v6 }
  0xf9   : > { %1696 = vmatmul.mubr.msk.bf16.vlgmr.msra.gmra.mrb[32].mxu1 %vm269_vm3, %v1237_v61 }
  0xfe   : > { %1619 = vmatmul.mubr.msk.bf16.vlgmr.msra.gmra.mrb[32].mxu0 %vm269_vm3, %v1237_v61  ;;  %vm1410_vm3 = vcmask 1048448  }
 0x18c   : > { %v358_v62 = vpop.f32.mrb[0].mxu1 }
 0x18d   : > { %v1649_v63 = vpop.f32.mrb[1].mxu1 }
 0x18e   : > { %v361_v0 = vpop.f32.mrb[2].mxu1 }
 0x18f   : > { %v1650_v2 = vpop.f32.mrb[3].mxu1 }
 0x191   : > { %v317_v1 = vpop.f32.mrb[0].mxu0 }
 0x192   : > { %v319_v4 = vpop.f32.mrb[1].mxu0 }
 0x193   : > { %v321_v5 = vpop.f32.mrb[2].mxu0 }
 0x194   : > { %v322_v7 = vpop.f32.mrb[3].mxu0  ;;  %v451_v8 = vpop.f32.mrb[4].mxu1 }
 0x195   : > { %v452_v3 = vadd.f32 %v451_v8, %v358_v62  ;;  %v1655_v10 = vpop.f32.mrb[5].mxu1 }
 0x196   : > { %v454_v12 = vpop.f32.mrb[6].mxu1 }
 0x197   : > { %v1656_v14 = vpop.f32.mrb[7].mxu1 }
 0x199   : > { %v410_v13 = vpop.f32.mrb[4].mxu0 }
 0x19a   : > { %v411_v6 = vadd.f32 %v410_v13, %v317_v1  ;;  %v412_v9 = vpop.f32.mrb[5].mxu0 }
 0x19b   : > { %v413_v15 = vadd.f32 %v412_v9, %v319_v4  ;;  %v414_v16 = vpop.f32.mrb[6].mxu0 }
 0x19c   : > { %v415_v17 = vpop.f32.mrb[7].mxu0  ;;  %v577_v18 = vpop.f32.mrb[8].mxu1 }
 0x19d   : > { %v585_v19 = vadd.f32 %v577_v18, %v452_v3  ;;  %v1661_v20 = vpop.f32.mrb[9].mxu1 }
 0x19e   : > { %v580_v21 = vpop.f32.mrb[10].mxu1 }
 0x19f   : > { %v1662_v23 = vpop.f32.mrb[11].mxu1  ;;  %v1364_v21 = vpop.permute.xlu0 %1363 }
 0x1a1   : > { %v536_v22 = vpop.f32.mrb[8].mxu0 }
 0x1a2   : > { %v583_v11 = vadd.f32 %v536_v22, %v411_v6  ;;  %v538_v24 = vpop.f32.mrb[9].mxu0 }
 0x1a3   : > { %v584_v25 = vadd.f32 %v538_v24, %v413_v15  ;;  %v540_v26 = vpop.f32.mrb[10].mxu0 }
 0x1a4   : > { %v541_v27 = vpop.f32.mrb[11].mxu0  ;;  %v706_v28 = vpop.f32.mrb[12].mxu1 }
 0x1a5   : > { %v714_v29 = vadd.f32 %v706_v28, %v585_v19  ;;  %v1667_v30 = vpop.f32.mrb[13].mxu1 }
 0x1a6   : > { %v709_v31 = vpop.f32.mrb[14].mxu1 }
 0x1a7   : > { %v1668_v33 = vpop.f32.mrb[15].mxu1 }
 0x1a9   : > { %v665_v32 = vpop.f32.mrb[12].mxu0 }
 0x1aa   : > { %v712_v34 = vadd.f32 %v665_v32, %v583_v11  ;;  %v667_v35 = vpop.f32.mrb[13].mxu0 }
 0x1ab   : > { %v713_v36 = vadd.f32 %v667_v35, %v584_v25  ;;  %v669_v37 = vpop.f32.mrb[14].mxu0 }
 0x1ac   : > { %v670_v38 = vpop.f32.mrb[15].mxu0  ;;  %v835_v39 = vpop.f32.mrb[16].mxu1 }
 0x1ad   : > { %v843_v40 = vadd.f32 %v835_v39, %v714_v29  ;;  %v1673_v41 = vpop.f32.mrb[17].mxu1 }
 0x1ae   : > { %v838_v42 = vpop.f32.mrb[18].mxu1 }
 0x1af   : > { %v1674_v44 = vpop.f32.mrb[19].mxu1 }
 0x1b1   : > { %v794_v43 = vpop.f32.mrb[16].mxu0 }
 0x1b2   : > { %v841_v45 = vadd.f32 %v794_v43, %v712_v34  ;;  %v796_v46 = vpop.f32.mrb[17].mxu0 }
 0x1b3   : > { %v842_v47 = vadd.f32 %v796_v46, %v713_v36  ;;  %v798_v48 = vpop.f32.mrb[18].mxu0 }
 0x1b4   : > { %v799_v49 = vpop.f32.mrb[19].mxu0  ;;  %v964_v50 = vpop.f32.mrb[20].mxu1 }
 0x1b5   : > { %v972_v51 = vadd.f32 %v964_v50, %v843_v40  ;;  %v1679_v52 = vpop.f32.mrb[21].mxu1 }
 0x1b6   : > { %v967_v53 = vpop.f32.mrb[22].mxu1 }
 0x1b7   : > { %v1680_v55 = vpop.f32.mrb[23].mxu1 }
 0x1b9   : > { %v923_v54 = vpop.f32.mrb[20].mxu0 }
 0x1ba   : > { %v970_v56 = vadd.f32 %v923_v54, %v841_v45  ;;  %v925_v57 = vpop.f32.mrb[21].mxu0 }
 0x1bb   : > { %v971_v58 = vadd.f32 %v925_v57, %v842_v47  ;;  %v927_v59 = vpop.f32.mrb[22].mxu0 }
 0x1bc   : > { %v928_v60 = vpop.f32.mrb[23].mxu0  ;;  %v1093_v61 = vpop.f32.mrb[24].mxu1 }
 0x1bd   : > { %v1101_v62 = vadd.f32 %v1093_v61, %v972_v51  ;;  %v1685_v63 = vpop.f32.mrb[25].mxu1 }
 0x1be   : > { %v1096_v0 = vpop.f32.mrb[26].mxu1 }
 0x1bf   : > { %v1686_v2 = vpop.f32.mrb[27].mxu1 }
 0x1c1   : > { %v1052_v1 = vpop.f32.mrb[24].mxu0 }
 0x1c2   : > { %v1099_v4 = vadd.f32 %v1052_v1, %v970_v56  ;;  %v1054_v5 = vpop.f32.mrb[25].mxu0 }
 0x1c3   : > { %v1100_v7 = vadd.f32 %v1054_v5, %v971_v58  ;;  %v1056_v8 = vpop.f32.mrb[26].mxu0 }
 0x1c4   : > { %v1057_v3 = vpop.f32.mrb[27].mxu0  ;;  %v1222_v10 = vpop.f32.mrb[28].mxu1 }
 0x1c5   : > { %v1230_v12 = vadd.f32 %v1222_v10, %v1101_v62  ;;  %v1691_v13 = vpop.f32.mrb[29].mxu1 }
 0x1c6   : > { %v1225_v14 = vpop.f32.mrb[30].mxu1 }
 0x1c7   : > { %v1692_v9 = vpop.f32.mrb[31].mxu1 }
 0x1c9   : > { %v1181_v6 = vpop.f32.mrb[28].mxu0 }
 0x1ca   : > { %v1228_v15 = vadd.f32 %v1181_v6, %v1099_v4  ;;  %v1183_v16 = vpop.f32.mrb[29].mxu0 }
 0x1cb   : > { %v1229_v17 = vadd.f32 %v1183_v16, %v1100_v7  ;;  %v1185_v18 = vpop.f32.mrb[30].mxu0 }
 0x1cc   : > { %v1186_v19 = vpop.f32.mrb[31].mxu0  ;;  %v1351_v20 = vpop.f32.mrb[32].mxu1 }
 0x1cd   : > { %v1359_v22 = vadd.f32 %v1351_v20, %v1230_v12  ;;  %v1697_v23 = vpop.f32.mrb[33].mxu1 }
 0x1ce   : > { %v1354_v11 = vpop.f32.mrb[34].mxu1 }
 0x1cf   : > { %v1368_v24 = vadd.f32 %v1364_v21, %v1359_v22  ;;  %v1698_v26 = vpop.f32.mrb[35].mxu1 }
 0x1d1   : > { %v1310_v25 = vpop.f32.mrb[32].mxu0  ;;  %1439 = vrot.lane.b32.xlu0 %v1368_v24, %s1937_s19 }
 0x1d2   : > { %v1357_v27 = vadd.f32 %v1310_v25, %v1228_v15  ;;  %v1312_v28 = vpop.f32.mrb[33].mxu0 }
 0x1d3   : > { %v1358_v29 = vadd.f32 %v1312_v28, %v1229_v17  ;;  %v1314_v30 = vpop.f32.mrb[34].mxu0 }
 0x1d4   : > { %v1366_v31 = vadd.f32 %v1364_v21, %v1357_v27  ;;  %v1315_v32 = vpop.f32.mrb[35].mxu0 }
 0x1d5   : > { %v1367_v33 = vadd.f32 %v1364_v21, %v1358_v29 }
 0x1d6   : > { %1372 = vrot.lane.b32.xlu1 %v1366_v31, %s1927_s10  ;;  %1370 = vst.msk [vmem:[%s2260_s21] sm:$0xff] %vm1369_vm11, %v1366_v31  ;;  %1403 = vrot.lane.b32.xlu0 %v1366_v31, %s1940_s28  ;;  %s1943_s10 = smov 118  }
 0x1da   : > { %1377 = vrot.lane.b32.xlu1 %v1366_v31, %s1926_s9  ;;  %1416 = vrot.lane.b32.xlu0 %v1367_v33, %s1929_s23  ;;  %s1945_s9 = smov 98   ;;  %s1466_s23 = sshll.u32 %s2260_s21, 4  ;;  %s2306_s23 = int_to_ptr.vmem [resolvable:$true] %s1466_s23 }
 0x1de   : > { %1382 = vrot.lane.b32.xlu1 %v1366_v31, %s1941_s18  ;;  %1420 = vrot.lane.b32.xlu0 %v1367_v33, %s1933_s4 }
 0x1e2   : > { %1387 = vrot.lane.b32.xlu1 %v1366_v31, %s1928_s22  ;;  %1424 = vrot.lane.b32.xlu0 %v1367_v33, %s1942_s29  ;;  %s1626_s22 = sshll.u32 %s1910_s15, 8  ;;  %s1450_s15 = scalar_lea.sflag [#allocation4], %s2076_s6 }
 0x1e3   : > { %s2304_s4 = scalar_lea.hbm %s2357_s3, %s1626_s22 }
 0x1e6   : > { %1392 = vrot.lane.b32.xlu1 %v1366_v31, %s1943_s10  ;;  %1428 = vrot.lane.b32.xlu0 %v1367_v33, %s1935_s5  ;;  %s1836_s5 = scalar_lea.vmem %s2306_s23, 256 }
 0x1e7   : > { %p1837_p8 = scmp.ne.s32.totalorder %s2306_s23, %s1836_s5 }
 0x1e9   : > { %p1838_p11 = pnand %p1837_p8, %p2365_p9 }
 0x1ea   : > { %1397 = vrot.lane.b32.xlu1 %v1366_v31, %s1930_s30  ;;  %1432 = vrot.lane.b32.xlu0 %v1367_v33, %s1944_s11 }
 0x1eb   : > { %p1839_p0 = pneg %p1838_p11 }
 0x1ee   : > { %1412 = vrot.lane.b32.xlu1 %v1367_v33, %s1932_s24  ;;  %1445 = vrot.lane.b32.xlu0 %v1368_v24, %s1945_s9 }
 0x1f2   : > { %1437 = vrot.lane.b32.xlu1 %v1367_v33, %s1937_s19  ;;  %s1946_s19 = smov [#allocation5]  }
 0x1f3   : > { %s1840_s8 = sshll.u32 %s1946_s19, 4  ;;  %s1841_s8 = int_to_ptr.vmem [resolvable:$false] %s1840_s8 }
 0x1f4   : > { %s1842_s7 = scalar_lea.vmem %s1841_s8, 512  ;;  %p1843_p5 = scmp.lt.s32.totalorder %s2306_s23, %s1841_s8 }
 0x1f5   : > { %p1844_p13 = scmp.lt.s32.totalorder %s1842_s7, %s1836_s5 }
 0x1f6   : > { %1405 = vrot.lane.b32.xlu1 %v1367_v33, %s1940_s28 }
 0x1f7   : > { %p1845_p2 = por %p1844_p13, %p1843_p5 }
 0x1f9   : > { %p1846_p4 = pnand %p1845_p2, %p1839_p0 }
 0x243   : > { %v1440_v34 = vpop.permute.xlu0 %1439 }
 0x248   : > { %v1373_v35 = vpop.permute.xlu1 %1372  ;;  %v1404_v36 = vpop.permute.xlu0 %1403 }
 0x249   : > { %1376 = vst.msk [vmem:[%s2260_s21] sm:$0xff] %vm1375_vm12, %v1373_v35 }
 0x24c   : > { %v1378_v37 = vpop.permute.xlu1 %1377  ;;  %v1417_v38 = vpop.permute.xlu0 %1416 }
 0x24d   : > { %1381 = vst.msk [vmem:[%s2260_s21] sm:$0xff] %vm1380_vm13, %v1378_v37 }
 0x250   : > { %v1383_v39 = vpop.permute.xlu1 %1382  ;;  %v1421_v40 = vpop.permute.xlu0 %1420 }
 0x251   : > { %1386 = vst.msk [vmem:[%s2260_s21] sm:$0xff] %vm1385_vm14, %v1383_v39 }
 0x254   : > { %v1388_v41 = vpop.permute.xlu1 %1387  ;;  %v1425_v42 = vpop.permute.xlu0 %1424 }
 0x255   : > { %1391 = vst.msk [vmem:[%s2260_s21] sm:$0xff] %vm1390_vm15, %v1388_v41 }
 0x258   : > { %v1393_v43 = vpop.permute.xlu1 %1392  ;;  %v1429_v44 = vpop.permute.xlu0 %1428 }
 0x259   : > { %1396 = vst.msk [vmem:[%s2260_s21] sm:$0xff] %vm1395_vm0, %v1393_v43 }
 0x25c   : > { %v1398_v45 = vpop.permute.xlu1 %1397  ;;  %v1433_v47 = vpop.permute.xlu0 %1432 }
 0x25d   : > { %1401 = vst.msk [vmem:[%s2260_s21] sm:$0xff] %vm1400_vm1, %v1398_v45 }
 0x260   : > { %v1413_v46 = vpop.permute.xlu1 %1412  ;;  %v1446_v50 = vpop.permute.xlu0 %1445 }
 0x261   : > { %1415 = vst.msk [vmem:[%s2260_s21 + $0x8] sm:$0xff] %vm1369_vm11, %v1413_v46 }
 0x262   : > { %1419 = vst.msk [vmem:[%s2260_s21 + $0x8] sm:$0xff] %vm1375_vm12, %v1417_v38 }
 0x263   : > { %1423 = vst.msk [vmem:[%s2260_s21 + $0x8] sm:$0xff] %vm1380_vm13, %v1421_v40 }
 0x264   : > { %1427 = vst.msk [vmem:[%s2260_s21 + $0x8] sm:$0xff] %vm1385_vm14, %v1425_v42  ;;  %v1438_v48 = vpop.permute.xlu1 %1437 }
 0x265   : > { %1431 = vst.msk [vmem:[%s2260_s21 + $0x8] sm:$0xff] %vm1390_vm15, %v1429_v44  ;;  %v1442_v49 = vsel %vm1441_vm2, %v1438_v48, %v1440_v34 }
 0x266   : > { %1435 = vst.msk [vmem:[%s2260_s21 + $0x8] sm:$0xff] %vm1395_vm0, %v1433_v47 }
 0x267   : > { %1444 = vst.msk [vmem:[%s2260_s21 + $0x8] sm:$0xff] %vm1400_vm1, %v1442_v49 }
 0x268   : > { %v1406_v51 = vpop.permute.xlu1 %1405  ;;  %1448 = vst.msk [vmem:[%s2260_s21 + $0x8] sm:$0xff] %vm1410_vm3, %v1446_v50 }
 0x269   : > { %v1408_v52 = vsel %vm1407_vm4, %v1404_v36, %v1406_v51 }
 0x26a   : > { %1411 = vst.msk [vmem:[%s2260_s21] sm:$0xff] %vm1410_vm3, %v1408_v52 }
 0x26b   : > { %1849 = shalt.err (!%p1846_p4)
}
 0x26c   : > { %s1850_s6 = scalar_lea.hbm %s2304_s4, 256  ;;  %s1854_s18 = scalar_lea.hbm %s2357_s3, 512 }
 0x26d   : > { %p1851_p6 = scmp.ne.s32.totalorder %s2304_s4, %s1850_s6  ;;  %p1855_p12 = scmp.lt.u32.totalorder %s2304_s4, %s2357_s3 }
 0x26e   : > { %p1856_p1 = scmp.lt.u32.totalorder %s1854_s18, %s1850_s6  ;;  %p1858_p8 = scmp.lt.u32.totalorder %s1850_s6, %s2304_s4 }
 0x26f   : > { %p1852_p7 = pnand %p1851_p6, %p2365_p9 }
 0x270   : > { %p1857_p3 = por %p1856_p1, %p1855_p12 }
 0x271   : > { %p1853_p10 = pneg %p1852_p7 }
 0x272   : > { %p1859_p11 = por %p1858_p8, %p1857_p3 }
 0x274   : > { %p1860_p0 = pnand %p1859_p11, %p1853_p10 }
 0x276   : > { %1863 = shalt.err (!%p1860_p0)
}
 0x277   : > { %1704 = dma.vmem_to_hbm [thread:$0]  (%p2365_p9), %s2306_s23, 256, %s2304_s4, %s1450_s15  }
 0x278 PF: > { %s1478_s11 = sand.u32 1, %s1898_s12   ;;  %p2366_p5 = scmp.ne.s32.totalorder %s2362_s27, 0 }
 0x279   : > { %p2367_p13 = scmp.ge.s32.totalorder %s1918_s17, 2  ;;  %s1479_s9 = scalar_lea.sflag [#allocation4], %s1478_s11 }
 0x27b   : > { %p1711_p2 = pnand %p2367_p13, %p2366_p5 }
 0x27d   : > { %1893 = dma.done.wait (!%p1711_p2), %s1479_s9, 256  }
 0x27e   : > { %1895 = vsyncadd (!%p1711_p2), %s1479_s9, 4294967040  ;;  %s19_s17 = sadd.s32 1, %s1918_s17   ;;  %s2368_s12 = smov %s1902_s13 }
 0x27f   : > { %p16_p4 = scmp.ge.s32.totalorder %s19_s17, 4   ;;  %s2369_s13 = smov %s1906_s14 }
 0x280   : > { %s2370_s14 = smov %s2023_s26  ;;  %s2371_s15 = smov %s1914_s16 }
 0x281   : > { %s2372_s16 = smov %s2374_s20  ;;  %18 = sbr.rel (!%p16_p4) target bundleno = 6 (0x6), region = 83 }
 0x288   :  { %1484 = vsyncpa [#allocation3], 1 }
 0x289   :  { %1486 = vsyncpa [#allocation3 + $0x1], 1 }
 0x28a   :  { %1487 = vsyncpa [#allocation4], 1 }
 0x28b   :  { %1489 = vsyncpa [#allocation4 + $0x1], 1 }

</bundles_post_ra>
